<compile_context>
chip_gen: v6e
topology: v6e:2x2x1
jax: 0.10.0
libtpu: 0.0.40
codegen_flags: <defaults>
</compile_context>

<pallas_src>
import functools

import jax
import jax.numpy as jnp
from jax.experimental import pallas as pl
from jax.experimental.pallas import tpu as pltpu


def _label_smooth_ce_kernel(pred_ref, label_ref, out_ref, *, smoothing: float,
                            n_total: int, tile_n: int, tiles_per_part: int):
    pi = pl.program_id(0)          # parallel part (megacore split)
    ti = pl.program_id(1)          # tile index within the part (reduction axis)
    tile_idx = pi * tiles_per_part + ti

    x = pred_ref[...].astype(jnp.float32)     # (TN, C) logits, cast per tile
    lbl = label_ref[...]                      # (TN, 1) int32
    tn, c = x.shape

    # Rows that really exist (ragged last tile / clamped duplicate tiles of an
    # uneven part split evaluate to all-invalid and contribute zero).
    row = tile_idx * tile_n + jax.lax.broadcasted_iota(jnp.int32, (tn, 1), 0)
    valid = row < n_total                     # (TN, 1) bool
    x = jnp.where(valid, x, 0.0)              # keep padded rows finite

    # Row reductions (stable logsumexp).
    m = jnp.max(x, axis=1, keepdims=True)                               # (TN, 1)
    lse = jnp.log(jnp.sum(jnp.exp(x - m), axis=1, keepdims=True)) + m   # (TN, 1)
    sum_x = jnp.sum(x, axis=1, keepdims=True)                           # (TN, 1)

    # x[label] via iota==label masked reduce (no gather).
    cls = jax.lax.broadcasted_iota(jnp.int32, (tn, c), 1)
    x_lbl = jnp.sum(jnp.where(cls == lbl, x, 0.0), axis=1, keepdims=True)

    # loss_i = -[(1-s) * log_p[label] + s/(C-1) * (sum_c log_p - log_p[label])]
    #        = (on + off*C) * lse - on * x[label] - off * sum_c x
    off = smoothing / (c - 1)                 # assumes C >= 2
    on = 1.0 - smoothing - off
    per_sample = (on + off * c) * lse - on * x_lbl - off * sum_x        # (TN, 1)

    partial = jnp.sum(jnp.where(valid, per_sample, 0.0))

    @pl.when(ti == 0)
    def _():
        out_ref[...] = jnp.zeros_like(out_ref)
    out_ref[...] += partial


def label_smooth_ce_loss(pred: jax.Array, label: jax.Array, smoothing: float = 0.1,
                         *, tile_n: int = 1024, num_parts: int = 2) -> jax.Array:
    """pred: (N, C) float (any float dtype), label: (N,) int -> scalar f32 loss."""
    n, c = pred.shape
    label2d = label.astype(jnp.int32).reshape(n, 1)

    # Row-tile size: sublane-aligned (multiple of 8) when tiling, capped so a
    # double-buffered logits tile stays well inside VMEM; full batch if it
    # already fits in one tile.
    bytes_per_row = c * pred.dtype.itemsize
    vmem_budget = 8 * 1024 * 1024                      # per-input, double-buffered
    cap = max(8, (vmem_budget // (2 * bytes_per_row)) // 8 * 8)
    tn_req = max(8, min(int(tile_n) // 8 * 8, cap))
    tn = n if n <= tn_req else tn_req

    t_total = -(-n // tn)                       # number of row tiles
    p = max(1, min(num_parts, t_total))         # parallel parts (v7x: 2 TCs)
    tpp = -(-t_total // p)                      # tiles per part

    kernel = functools.partial(
        _label_smooth_ce_kernel,
        smoothing=float(smoothing), n_total=n, tile_n=tn, tiles_per_part=tpp)

    def tile_map(pi, ti):
        idx = pi * tpp + ti
        # Clamp so an uneven split never indexes past the array; the kernel
        # masks those rows anyway.
        return (jnp.minimum(idx, t_total - 1), 0)

    out = pl.pallas_call(
        kernel,
        out_shape=jax.ShapeDtypeStruct((p, 1, 1), jnp.float32),  # per-part sums
        grid=(p, tpp),
        in_specs=[
            pl.BlockSpec((tn, c), tile_map),   # logits tile, native dtype
            pl.BlockSpec((tn, 1), tile_map),   # labels tile
        ],
        out_specs=pl.BlockSpec((1, 1, 1), lambda pi, ti: (pi, 0, 0)),
        compiler_params=pltpu.CompilerParams(
            dimension_semantics=("parallel", "arbitrary")),
    )(pred, label2d)

    return jnp.sum(out) / n                     # mean over the true batch size


def _reference(pred, label, smoothing=0.1):
    c = pred.shape[1]
    p = jax.nn.softmax(pred.astype(jnp.float32), axis=1)
    oh = jax.nn.one_hot(label, c, dtype=jnp.float32)
    w = (1.0 - smoothing) * oh + (smoothing / (c - 1)) * (1.0 - oh)
    return jnp.mean(jnp.sum(-jnp.log(p) * w, axis=1))


if __name__ == "__main__":
    key = jax.random.PRNGKey(0)
    k1, k2, k3, k4, k5, k6 = jax.random.split(key, 6)

    # Small shape consistent with the module: batch=8 logits over 32 classes.
    N, C = 8, 32
    pred = jax.random.normal(k1, (N, C), dtype=jnp.float32)
    label = jax.random.randint(k2, (N,), 0, C, dtype=jnp.int32)
    loss = label_smooth_ce_loss(pred, label, smoothing=0.1)
    jax.block_until_ready(loss)
    ref = _reference(pred, label, 0.1)
    assert jnp.allclose(loss, ref, rtol=1e-5, atol=1e-5), (loss, ref)

    # Ragged last tile + 2-part split path (N not a multiple of the tile,
    # forced small tile so the pipelined/multi-part code runs).
    N2, C2 = 50, 160
    pred2 = jax.random.normal(k3, (N2, C2), dtype=jnp.float32)
    label2 = jax.random.randint(k4, (N2,), 0, C2, dtype=jnp.int32)
    loss2 = label_smooth_ce_loss(pred2, label2, smoothing=0.1,
                                 tile_n=16, num_parts=2)
    jax.block_until_ready(loss2)
    ref2 = _reference(pred2, label2, 0.1)
    assert jnp.allclose(loss2, ref2, rtol=1e-5, atol=1e-5), (loss2, ref2)

    # bf16 logits path (native-dtype DMA, in-kernel f32 cast).
    N3, C3 = 24, 64
    pred3 = jax.random.normal(k5, (N3, C3), dtype=jnp.bfloat16)
    label3 = jax.random.randint(k6, (N3,), 0, C3, dtype=jnp.int32)
    loss3 = label_smooth_ce_loss(pred3, label3, smoothing=0.1, tile_n=8)
    jax.block_until_ready(loss3)
    ref3 = _reference(pred3, label3, 0.1)
    assert jnp.allclose(loss3, ref3, rtol=1e-3, atol=1e-3), (loss3, ref3)

    print("KERNEL_OK")
</pallas_src>

<mosaic_0001>
module attributes {stable_mosaic.version = 11 : i64} {
  func.func @_label_smooth_ce_kernel(%arg0: i32, %arg1: i32, %arg2: memref<8x32xf32, #tpu.memory_space<vmem>>, %arg3: memref<8x1xi32, #tpu.memory_space<vmem>>, %arg4: memref<1x1x1xf32, #tpu.memory_space<vmem>>) attributes {dimension_semantics = [#tpu.dimension_semantics<parallel>, #tpu.dimension_semantics<arbitrary>], iteration_bounds = array<i64: 1, 1>, scalar_prefetch = 0 : i64, scratch_operands = 0 : i64, tpu.core_type = #tpu.core_type<tc>, window_params = [{transform_indices = @transform_0, window_bounds = array<i64: 8, 32>}, {transform_indices = @transform_1, window_bounds = array<i64: 8, 1>}, {transform_indices = @transform_2, window_bounds = array<i64: 1, 1, 1>}]} {
    %c1_i32 = arith.constant 1 : i32
    %0 = arith.muli %arg0, %c1_i32 : i32
    %1 = arith.addi %0, %arg1 : i32
    %c0 = arith.constant 0 : index
    %c0_0 = arith.constant 0 : index
    %2 = vector.load %arg2[%c0, %c0_0] : memref<8x32xf32, #tpu.memory_space<vmem>>, vector<8x32xf32>
    %c0_1 = arith.constant 0 : index
    %c0_2 = arith.constant 0 : index
    %3 = vector.load %arg3[%c0_1, %c0_2] : memref<8x1xi32, #tpu.memory_space<vmem>>, vector<8x1xi32>
    %c8_i32 = arith.constant 8 : i32
    %4 = arith.muli %1, %c8_i32 : i32
    %5 = tpu.iota {dimensions = array<i32: 0>} : vector<8x1xi32>
    %6 = vector.broadcast %4 : i32 to vector<8x1xi32>
    %7 = arith.addi %6, %5 : vector<8x1xi32>
    %c8_i32_3 = arith.constant 8 : i32
    %8 = vector.broadcast %c8_i32_3 : i32 to vector<8x1xi32>
    %9 = arith.cmpi slt, %7, %8 : vector<8x1xi32>
    %cst = arith.constant 0.000000e+00 : f32
    %10 = vector.shape_cast %9 : vector<8x1xi1> to vector<8x1xi1>
    %11 = vector.broadcast %10 : vector<8x1xi1> to vector<8x32xi1>
    %12 = vector.broadcast %cst : f32 to vector<8x32xf32>
    %13 = arith.select %11, %2, %12 : vector<8x32xi1>, vector<8x32xf32>
    %cst_4 = arith.constant dense<0xFF800000> : vector<8xf32>
    %14 = vector.multi_reduction <maximumf>, %13, %cst_4 [1] : vector<8x32xf32> to vector<8xf32>
    %15 = vector.shape_cast %14 : vector<8xf32> to vector<8x1xf32>
    %16 = vector.broadcast %15 : vector<8x1xf32> to vector<8x32xf32>
    %17 = arith.subf %13, %16 : vector<8x32xf32>
    %18 = math.exp %17 : vector<8x32xf32>
    %cst_5 = arith.constant dense<0.000000e+00> : vector<8xf32>
    %19 = vector.multi_reduction <add>, %18, %cst_5 [1] : vector<8x32xf32> to vector<8xf32>
    %20 = vector.shape_cast %19 : vector<8xf32> to vector<8x1xf32>
    %21 = math.log %20 : vector<8x1xf32>
    %22 = arith.addf %21, %15 : vector<8x1xf32>
    %cst_6 = arith.constant dense<0.000000e+00> : vector<8xf32>
    %23 = vector.multi_reduction <add>, %13, %cst_6 [1] : vector<8x32xf32> to vector<8xf32>
    %24 = vector.shape_cast %23 : vector<8xf32> to vector<8x1xf32>
    %25 = tpu.iota {dimensions = array<i32: 1>} : vector<8x32xi32>
    %26 = vector.broadcast %3 : vector<8x1xi32> to vector<8x32xi32>
    %27 = arith.cmpi eq, %25, %26 : vector<8x32xi32>
    %cst_7 = arith.constant 0.000000e+00 : f32
    %28 = vector.broadcast %cst_7 : f32 to vector<8x32xf32>
    %29 = arith.select %27, %13, %28 : vector<8x32xi1>, vector<8x32xf32>
    %cst_8 = arith.constant dense<0.000000e+00> : vector<8xf32>
    %30 = vector.multi_reduction <add>, %29, %cst_8 [1] : vector<8x32xf32> to vector<8xf32>
    %31 = vector.shape_cast %30 : vector<8xf32> to vector<8x1xf32>
    %cst_9 = arith.constant 1.000000e+00 : f32
    %32 = vector.broadcast %cst_9 : f32 to vector<8x1xf32>
    %33 = arith.mulf %32, %22 : vector<8x1xf32>
    %cst_10 = arith.constant 0.896774172 : f32
    %34 = vector.broadcast %cst_10 : f32 to vector<8x1xf32>
    %35 = arith.mulf %34, %31 : vector<8x1xf32>
    %36 = arith.subf %33, %35 : vector<8x1xf32>
    %cst_11 = arith.constant 0.0032258064 : f32
    %37 = vector.broadcast %cst_11 : f32 to vector<8x1xf32>
    %38 = arith.mulf %37, %24 : vector<8x1xf32>
    %39 = arith.subf %36, %38 : vector<8x1xf32>
    %cst_12 = arith.constant 0.000000e+00 : f32
    %40 = vector.broadcast %cst_12 : f32 to vector<8x1xf32>
    %41 = arith.select %9, %39, %40 : vector<8x1xi1>, vector<8x1xf32>
    %42 = vector.shape_cast %41 : vector<8x1xf32> to vector<1x8x1xf32>
    %cst_13 = arith.constant dense<0.000000e+00> : vector<1xf32>
    %43 = vector.multi_reduction <add>, %42, %cst_13 [1, 2] : vector<1x8x1xf32> to vector<1xf32>
    %44 = vector.shape_cast %43 : vector<1xf32> to vector<1x1x1xf32>
    %45 = vector.extract %44[0, 0, 0] : f32 from vector<1x1x1xf32>
    %c0_i32 = arith.constant 0 : i32
    %46 = arith.cmpi eq, %arg1, %c0_i32 : i32
    %47 = arith.extui %46 : i1 to i32
    %c0_i32_14 = arith.constant 0 : i32
    %48 = arith.cmpi ne, %47, %c0_i32_14 : i32
    scf.if %48 {
      %cst_21 = arith.constant 0.000000e+00 : f32
      %53 = vector.broadcast %cst_21 : f32 to vector<1x1x1xf32>
      %c0_22 = arith.constant 0 : index
      %c0_23 = arith.constant 0 : index
      %c0_24 = arith.constant 0 : index
      %54 = vector.load %arg4[%c0_22, %c0_23, %c0_24] : memref<1x1x1xf32, #tpu.memory_space<vmem>>, vector<1x1x1xf32>
      tpu.vector_store %arg4[%c0_22, %c0_23, %c0_24], %53 {strides = array<i32>} : memref<1x1x1xf32, #tpu.memory_space<vmem>>, vector<1x1x1xf32>,
    } else {
    }
    %c0_15 = arith.constant 0 : index
    %c0_16 = arith.constant 0 : index
    %c0_17 = arith.constant 0 : index
    %49 = vector.load %arg4[%c0_15, %c0_16, %c0_17] : memref<1x1x1xf32, #tpu.memory_space<vmem>>, vector<1x1x1xf32>
    %50 = vector.broadcast %45 : f32 to vector<1x1x1xf32>
    %51 = arith.addf %49, %50 : vector<1x1x1xf32>
    %c0_18 = arith.constant 0 : index
    %c0_19 = arith.constant 0 : index
    %c0_20 = arith.constant 0 : index
    %52 = vector.load %arg4[%c0_18, %c0_19, %c0_20] : memref<1x1x1xf32, #tpu.memory_space<vmem>>, vector<1x1x1xf32>
    tpu.vector_store %arg4[%c0_18, %c0_19, %c0_20], %51 {strides = array<i32>} : memref<1x1x1xf32, #tpu.memory_space<vmem>>, vector<1x1x1xf32>,
    return
  }
  func.func @transform_0(%arg0: i32, %arg1: i32) -> (i32, i32) {
    %c1_i32 = arith.constant 1 : i32
    %0 = arith.muli %arg0, %c1_i32 : i32
    %1 = arith.addi %0, %arg1 : i32
    %c0_i32 = arith.constant 0 : i32
    %2 = arith.minsi %1, %c0_i32 : i32
    %c0_i32_0 = arith.constant 0 : i32
    %c0_i32_1 = arith.constant 0 : i32
    return %2, %c0_i32_0 : i32, i32
  }
  func.func @transform_1(%arg0: i32, %arg1: i32) -> (i32, i32) {
    %c1_i32 = arith.constant 1 : i32
    %0 = arith.muli %arg0, %c1_i32 : i32
    %1 = arith.addi %0, %arg1 : i32
    %c0_i32 = arith.constant 0 : i32
    %2 = arith.minsi %1, %c0_i32 : i32
    %c0_i32_0 = arith.constant 0 : i32
    %c0_i32_1 = arith.constant 0 : i32
    return %2, %c0_i32_0 : i32, i32
  }
  func.func @transform_2(%arg0: i32, %arg1: i32) -> (i32, i32, i32) {
    %c0_i32 = arith.constant 0 : i32
    %c0_i32_0 = arith.constant 0 : i32
    %c0_i32_1 = arith.constant 0 : i32
    return %arg0, %c0_i32, %c0_i32_0 : i32, i32, i32
  }
}

</mosaic_0001>

<bundles_post_ra>
// kernel: tpu_custom_call.1
= control target key start
LH: loop header
LB: loop body
LE: loop exit
PB: predicated region body
PF: predicated region fallthrough
CT: control target
= control target key end

     0   :  { %vm78_vm0 = vcmask 261120   ;;  %s222_s0 = inlined_call_operand.vmem [shape: f32[8,32], index: 0, kind: input, shape index: {}]   ;;  %s223_s1 = inlined_call_operand.vmem [shape: s32[8,1], index: 1, kind: input, shape index: {}]   ;;  %s224_s2 = inlined_call_operand.hbm [shape: f32[1,1,1], index: 2, kind: output, shape index: {}]  }
   0x1   :  { %v67_v0 = vld [vmem:[%s222_s0] sm:$0xff] }
   0x2   :  { %7 = vsyncpa [#allocation3], 0  ;;  %v79_v1 = vsel %vm78_vm0, %v67_v0, -inf  ;;  %v189_v2 = vmov 0   ;;  %v68_v3 = vld [vmem:[%s223_s1] sm:$0xff]  ;;  %v94_v7 = vlaneseq  ;;  %v91_v14 = vsel %vm78_vm0, %v67_v0, 0.0 }
   0x3   :  { %162 = vset.pattern.permute.xlu0 %v189_v2  ;;  %vm109_vm2 = vcmask 7168   ;;  %vm124_vm3 = vcmask 0   ;;  %v190_v26 = vmov 0.0   ;;  %s191_s0 = smov [#allocation2]  }
   0x4   :  { %80 = vmax.xlane.f32.xlu0 %v79_v1  ;;  %v95_v8 = vand.u32 127, %v94_v7  ;;  %125 = vst.msk [vmem:[#allocation2] sm:$0x1] %vm124_vm3, %v190_v26  ;;  %s137_s1 = sshll.u32 %s191_s0, 4  ;;  %s138_s1 = int_to_ptr.vmem [resolvable:$true] %s137_s1 }
   0x5   :  { %s167_s14 = scalar_lea.vmem %s138_s1, 16  ;;  %s171_s15 = scalar_lea.vmem %s138_s1, 32 }
   0x6   :  { %p168_p0 = scmp.ne.s32.totalorder %s138_s1, %s167_s14  ;;  %p172_p1 = scmp.lt.s32.totalorder %s138_s1, %s138_s1 }
   0x7   :  { %p173_p2 = scmp.lt.s32.totalorder %s171_s15, %s167_s14 }
   0x9   :  { %p174_p3 = por %p173_p2, %p172_p1 }
   0xb   :  { %v126_v34 = vld [vmem:[#allocation2] sm:$0x1]  ;;  %p175_p4 = pnand %p174_p3, %p168_p0 }
  0x1a   :  { %97 = vperm.xlu0 %162, %v68_v3  }
  0x8d   :  { %v81_v4 = vpop.xlane.xlu0 %80 }
  0x8e   :  { %v82_v5 = vsub.f32 %v67_v0, %v81_v4 }
  0x90   :  { %v83_v6 = vmul.f32 1.442695, %v82_v5 }
  0x92   :  { %163 = vpow2.f32 %v83_v6 }
  0x95   :  { %v98_v9 = vpop.permute.xlu0 %97 }
  0x96   :  { %vm99_vm1 = vcmp.eq.s32.totalorder %v95_v8, %v98_v9 }
  0x97   :  { %v100_v11 = vsel %vm99_vm1, %v67_v0, 0.0 }
  0x98   :  { %v101_v13 = vsel %vm78_vm0, %v100_v11, 0.0 }
  0x9f   :  { %v164_v10 = vpop.eup %163 }
  0xa0   :  { %v85_v12 = vsel %vm78_vm0, %v164_v10, 0.0 }
  0xa1   :  { %86 = vadd.xlane.f32.xlu1 %v85_v12 }
  0xa5   :  { %102 = vadd.xlane.f32.xlu1 %v101_v13 }
  0xa9   :  { %92 = vadd.xlane.f32.xlu1 %v91_v14 }
 0x12a   :  { %v87_v15 = vpop.xlane.xlu1 %86 }
 0x12b   :  { %165 = vlog2.f32 %v87_v15 }
 0x12e   :  { %v103_v16 = vpop.xlane.xlu1 %102 }
 0x12f   :  { %v104_v21 = vmul.f32 0.8967742, %v103_v16 }
 0x132   :  { %v93_v18 = vpop.xlane.xlu1 %92 }
 0x133   :  { %v106_v22 = vmul.f32 0.0032258064, %v93_v18 }
 0x138   :  { %v166_v17 = vpop.eup %165 }
 0x139   :  { %v89_v19 = vmul.f32 0.6931472, %v166_v17 }
 0x13b   :  { %v90_v20 = vadd.f32 %v89_v19, %v81_v4 }
 0x13d   :  { %v105_v23 = vsub.f32 %v90_v20, %v104_v21 }
 0x13f   :  { %v107_v24 = vsub.f32 %v105_v23, %v106_v22 }
 0x141   :  { %v110_v25 = vsel %vm109_vm2, %v107_v24, 0.0 }
 0x142   :  { %111 = vadd.xlane.f32.xlu1 %v110_v25 }
 0x1cb   :  { %v112_v27 = vpop.xlane.xlu1 %111 }
 0x1cc   :  { %v113_v28 = vrot.slane %v112_v27, 4 }
 0x1ce   :  { %v114_v29 = vadd.f32 %v113_v28, %v112_v27 }
 0x1d0   :  { %v115_v30 = vrot.slane %v114_v29, 2 }
 0x1d2   :  { %v116_v31 = vadd.f32 %v115_v30, %v114_v29 }
 0x1d4   :  { %v117_v32 = vrot.slane %v116_v31, 1 }
 0x1d6   :  { %v118_v33 = vadd.f32 %v117_v32, %v116_v31 }
 0x1d8   :  { %157 = vpush %v118_v33 }
 0x209   :  { %s158_s13 = spop %157 }
 0x20a   :  { %v127_v35 = vstv %s158_s13 }
 0x20b   :  { %v128_v36 = vadd.f32 %v127_v35, %v126_v34 }
 0x20d   :  { %130 = vst.msk [vmem:[#allocation2] sm:$0x1] %vm124_vm3, %v128_v36 }
 0x20e   :  { %178 = shalt.err (!%p175_p4)
}
 0x20f   :  { %140 = dma.vmem_to_hbm [thread:$0]  %s138_s1, 16, %s224_s2, [#allocation3]  }
 0x210   :  { %187 = dma.done.wait [#allocation3], 16  }
 0x211   :  { %188 = vsyncadd [#allocation3], 4294967280 }
 0x212   :  { %144 = vsyncpa [#allocation3], 1 }

</bundles_post_ra>
